<compile_context>
chip_gen: v7x
topology: tpu7x:2x2x1
jax: 0.10.0
libtpu: 0.0.40
codegen_flags: <defaults>
</compile_context>

<pallas_src>
import jax
import jax.numpy as jnp
from jax.experimental import pallas as pl
from jax.experimental.pallas import tpu as pltpu


def _round_up(x, m):
    return ((x + m - 1) // m) * m


def _choose_tile(E, tile_e):
    rows = _round_up(E, 8)
    if rows <= 8:
        return rows
    # Aim for >= 2 grid steps so both v7x TensorCores get work; still one big
    # tile per step (multiple of 8 rows) to amortize per-step overhead.
    half = _round_up(-(-rows // 2), 8)
    return max(8, min(tile_e, half))


def message_kernel(hi_ref, hj_ref, ea_ref,
                   vec_ref,              # (3, Hp): rows = we1, be1, bm1_fused
                   wm1ij_ref,            # (2H, Hp): rows [:H] for h_i, [H:] for h_j
                   wm1e_ref,             # (Hp, Hp): we2 @ wm1_e (fused), zero padded
                   wm2_ref,              # (Hp, H):  K padded, true output width
                   bm2_ref,              # (1, H)
                   out_ref):             # (tile, H)
    H = hi_ref.shape[1]

    vec = vec_ref[...]
    we1 = vec[0:1, :]
    be1 = vec[1:2, :]
    bm1 = vec[2:3, :]

    # ---- edge encoder first layer: Linear(1, Hp) is a broadcasted outer product ----
    e = jnp.maximum(ea_ref[...] * we1 + be1, 0.0)                  # [TE, Hp]

    # ---- message MLP layer 1 (edge-encoder layer 2 folded into wm1e) ----
    wm1ij = wm1ij_ref[...]
    x = (jnp.dot(hi_ref[...], wm1ij[:H, :],
                 preferred_element_type=jnp.float32)
         + jnp.dot(hj_ref[...], wm1ij[H:, :],
                   preferred_element_type=jnp.float32)
         + jnp.dot(e, wm1e_ref[...], preferred_element_type=jnp.float32)
         + bm1)
    x = jnp.maximum(x, 0.0)                                        # [TE, Hp]

    # ---- message MLP layer 2 (true output width H, no column padding) ----
    out_ref[...] = (jnp.dot(x, wm2_ref[...], preferred_element_type=jnp.float32)
                    + bm2_ref[...]).astype(out_ref.dtype)


def message_function(h_i, h_j, edge_attr, params, *, tile_e=1024, lane=128):
    """Pallas MessageFunction forward.  h_i/h_j: [E,H], edge_attr: [E,1]."""
    E, H = h_i.shape
    (we1, be1, we2, be2, wm1, bm1, wm2, bm2) = params   # weights stored [in, out]

    # ---------- offline algebra: fold edge-encoder Linear #2 into wm1's e-slice ----------
    # (no nonlinearity between them, so e@we2@wm1_e == e@(we2@wm1_e); only the
    #  f32 summation order changes slightly vs the reference.)
    wm1_ij = wm1[:2 * H, :]                  # (2H, H): rows [:H] for h_i, [H:2H] for h_j
    wm1_e = wm1[2 * H:, :]                   # (H, H):  for edge embedding
    wm1_e_fused = we2 @ wm1_e                # (H, H)
    bm1_fused = bm1 + be2 @ wm1_e            # (1, H)

    # ---------- pad INTERNAL feature dims to lane-dense multiples of 128 ----------
    # NOTE: zero-padding correctness relies on ReLU(0) == 0.
    Hp = _round_up(H, lane)

    def pad_cols(a):
        return jnp.pad(a, ((0, 0), (0, Hp - a.shape[1])))

    vec = jnp.concatenate(
        [pad_cols(we1), pad_cols(be1), pad_cols(bm1_fused)], axis=0)   # (3, Hp)
    wm1ij_p = pad_cols(wm1_ij)                                         # (2H, Hp)
    wm1e_p = jnp.pad(wm1_e_fused, ((0, Hp - H), (0, Hp - H)))          # (Hp, Hp)
    wm2_p = jnp.pad(wm2, ((0, Hp - H), (0, 0)))                        # (Hp, H) K-pad only

    # ---------- pad ragged E (rows only) ----------
    tile = _choose_tile(E, tile_e)
    Ep = _round_up(E, tile)
    if Ep != E:
        pad_rows = ((0, Ep - E), (0, 0))
        h_i = jnp.pad(h_i, pad_rows)
        h_j = jnp.pad(h_j, pad_rows)
        edge_attr = jnp.pad(edge_attr, pad_rows)

    row_spec = lambda w: pl.BlockSpec((tile, w), lambda i: (i, 0))
    full_spec = lambda shape: pl.BlockSpec(shape, lambda i: (0, 0))

    flops = Ep * (2 * 2 * H * Hp + 2 * Hp * Hp + 2 * Hp * H)
    bytes_accessed = 4 * (Ep * (2 * H + 1 + H)
                          + 3 * Hp + 2 * H * Hp + Hp * Hp + Hp * H + H)

    out = pl.pallas_call(
        message_kernel,
        out_shape=jax.ShapeDtypeStruct((Ep, H), h_i.dtype),
        grid_spec=pl.GridSpec(
            grid=(Ep // tile,),
            in_specs=[
                row_spec(H),             # h_i   (pipelined)
                row_spec(H),             # h_j   (pipelined)
                row_spec(1),             # edge_attr (pipelined)
                full_spec((3, Hp)),      # [we1; be1; bm1_fused] (resident)
                full_spec((2 * H, Hp)),  # wm1 h_i/h_j halves    (resident)
                full_spec((Hp, Hp)),     # we2 @ wm1_e fused     (resident)
                full_spec((Hp, H)),      # wm2                   (resident)
                full_spec((1, H)),       # bm2                   (resident)
            ],
            out_specs=pl.BlockSpec((tile, H), lambda i: (i, 0)),
        ),
        compiler_params=pltpu.CompilerParams(
            dimension_semantics=("parallel",),
            vmem_limit_bytes=32 * 1024 * 1024,
        ),
        cost_estimate=pl.CostEstimate(
            flops=int(flops), transcendentals=0,
            bytes_accessed=int(bytes_accessed)),
    )(h_i, h_j, edge_attr, vec, wm1ij_p, wm1e_p, wm2_p, bm2)

    # Slice off E-row padding only if any (output already has true width H).
    return out if Ep == E else out[:E]


def init_params(key, hidden_dim):
    """Deterministic synthetic parameters.  Weights stored as [in, out]."""
    ks = jax.random.split(key, 8)
    H = hidden_dim

    def w(k, shape):
        return (jax.random.normal(k, shape, jnp.float32) * 0.05).astype(jnp.float32)

    we1 = w(ks[0], (1, H))            # edge_encoder Linear(1, H)
    be1 = w(ks[1], (1, H))
    we2 = w(ks[2], (H, H))            # edge_encoder Linear(H, H)
    be2 = w(ks[3], (1, H))
    wm1 = w(ks[4], (3 * H, H))        # message_mlp Linear(3H, H)
    bm1 = w(ks[5], (1, H))
    wm2 = w(ks[6], (H, H))            # message_mlp Linear(H, H)
    bm2 = w(ks[7], (1, H))
    return (we1, be1, we2, be2, wm1, bm1, wm2, bm2)


def reference(h_i, h_j, edge_attr, params):
    """Un-fused, un-padded reference matching the PyTorch module."""
    (we1, be1, we2, be2, wm1, bm1, wm2, bm2) = params
    e = jnp.maximum(edge_attr @ we1 + be1, 0.0) @ we2 + be2
    x = jnp.concatenate([h_i, h_j, e], axis=1)
    x = jnp.maximum(x @ wm1 + bm1, 0.0)
    return x @ wm2 + bm2


if __name__ == "__main__":
    hidden_dim = 32
    key = jax.random.PRNGKey(0)
    kp = jax.random.fold_in(key, 1)
    params = init_params(kp, hidden_dim)

    # E=16: tiny case (2 grid steps); E=300: ragged case exercising E-padding.
    for E in (16, 300):
        ki, kj, ke = jax.random.split(jax.random.fold_in(key, E), 3)
        h_i = jax.random.normal(ki, (E, hidden_dim), jnp.float32)
        h_j = jax.random.normal(kj, (E, hidden_dim), jnp.float32)
        edge_attr = jax.random.normal(ke, (E, 1), jnp.float32)

        out = jax.block_until_ready(message_function(h_i, h_j, edge_attr, params))
        ref = reference(h_i, h_j, edge_attr, params)

        assert out.shape == (E, hidden_dim)
        err = float(jnp.max(jnp.abs(out - ref)))
        assert jnp.allclose(out, ref, atol=1e-4, rtol=1e-4), f"max abs err {err}"

    print("KERNEL_OK")
</pallas_src>

<mosaic_0001>
module attributes {stable_mosaic.version = 11 : i64} {
  func.func @message_kernel(%arg0: i32, %arg1: memref<8x32xf32, #tpu.memory_space<vmem>>, %arg2: memref<8x32xf32, #tpu.memory_space<vmem>>, %arg3: memref<8x1xf32, #tpu.memory_space<vmem>>, %arg4: memref<3x128xf32, #tpu.memory_space<vmem>>, %arg5: memref<64x128xf32, #tpu.memory_space<vmem>>, %arg6: memref<128x128xf32, #tpu.memory_space<vmem>>, %arg7: memref<128x32xf32, #tpu.memory_space<vmem>>, %arg8: memref<1x32xf32, #tpu.memory_space<vmem>>, %arg9: memref<8x32xf32, #tpu.memory_space<vmem>>) attributes {dimension_semantics = [#tpu.dimension_semantics<parallel>], iteration_bounds = array<i64: 2>, scalar_prefetch = 0 : i64, scratch_operands = 0 : i64, tpu.core_type = #tpu.core_type<tc>, window_params = [{transform_indices = @transform_0, window_bounds = array<i64: 8, 32>}, {transform_indices = @transform_1, window_bounds = array<i64: 8, 32>}, {transform_indices = @transform_2, window_bounds = array<i64: 8, 1>}, {pipeline_mode = #tpu.pipeline_mode<synchronous>, transform_indices = @transform_3, window_bounds = array<i64: 3, 128>}, {pipeline_mode = #tpu.pipeline_mode<synchronous>, transform_indices = @transform_4, window_bounds = array<i64: 64, 128>}, {pipeline_mode = #tpu.pipeline_mode<synchronous>, transform_indices = @transform_5, window_bounds = array<i64: 128, 128>}, {pipeline_mode = #tpu.pipeline_mode<synchronous>, transform_indices = @transform_6, window_bounds = array<i64: 128, 32>}, {pipeline_mode = #tpu.pipeline_mode<synchronous>, transform_indices = @transform_7, window_bounds = array<i64: 1, 32>}, {transform_indices = @transform_8, window_bounds = array<i64: 8, 32>}]} {
    %c0 = arith.constant 0 : index
    %c0_0 = arith.constant 0 : index
    %0 = vector.load %arg4[%c0, %c0_0] : memref<3x128xf32, #tpu.memory_space<vmem>>, vector<3x128xf32>
    %1 = vector.extract_strided_slice %0 {offsets = [0, 0], sizes = [1, 128], strides = [1, 1]} : vector<3x128xf32> to vector<1x128xf32>
    %2 = vector.extract_strided_slice %0 {offsets = [1, 0], sizes = [1, 128], strides = [1, 1]} : vector<3x128xf32> to vector<1x128xf32>
    %3 = vector.extract_strided_slice %0 {offsets = [2, 0], sizes = [1, 128], strides = [1, 1]} : vector<3x128xf32> to vector<1x128xf32>
    %c0_1 = arith.constant 0 : index
    %c0_2 = arith.constant 0 : index
    %4 = vector.load %arg3[%c0_1, %c0_2] : memref<8x1xf32, #tpu.memory_space<vmem>>, vector<8x1xf32>
    %5 = vector.broadcast %4 : vector<8x1xf32> to vector<8x128xf32>
    %6 = vector.broadcast %1 : vector<1x128xf32> to vector<8x128xf32>
    %7 = arith.mulf %5, %6 : vector<8x128xf32>
    %8 = vector.broadcast %2 : vector<1x128xf32> to vector<8x128xf32>
    %9 = arith.addf %7, %8 : vector<8x128xf32>
    %cst = arith.constant 0.000000e+00 : f32
    %10 = vector.broadcast %cst : f32 to vector<8x128xf32>
    %11 = arith.maximumf %9, %10 : vector<8x128xf32>
    %c0_3 = arith.constant 0 : index
    %c0_4 = arith.constant 0 : index
    %12 = vector.load %arg5[%c0_3, %c0_4] : memref<64x128xf32, #tpu.memory_space<vmem>>, vector<64x128xf32>
    %c0_5 = arith.constant 0 : index
    %c0_6 = arith.constant 0 : index
    %13 = vector.load %arg1[%c0_5, %c0_6] : memref<8x32xf32, #tpu.memory_space<vmem>>, vector<8x32xf32>
    %14 = vector.extract_strided_slice %12 {offsets = [0, 0], sizes = [32, 128], strides = [1, 1]} : vector<64x128xf32> to vector<32x128xf32>
    %cst_7 = arith.constant dense<0.000000e+00> : vector<8x128xf32>
    %15 = tpu.matmul %13, %14, %cst_7 {dimension_numbers = #tpu.dot_dimension_numbers<[1], [0], [0], [1], [0, 0, 1, 1], [], []>} : vector<8x32xf32>, vector<32x128xf32>, vector<8x128xf32> -> vector<8x128xf32>
    %c0_8 = arith.constant 0 : index
    %c0_9 = arith.constant 0 : index
    %16 = vector.load %arg2[%c0_8, %c0_9] : memref<8x32xf32, #tpu.memory_space<vmem>>, vector<8x32xf32>
    %17 = vector.extract_strided_slice %12 {offsets = [32, 0], sizes = [32, 128], strides = [1, 1]} : vector<64x128xf32> to vector<32x128xf32>
    %cst_10 = arith.constant dense<0.000000e+00> : vector<8x128xf32>
    %18 = tpu.matmul %16, %17, %cst_10 {dimension_numbers = #tpu.dot_dimension_numbers<[1], [0], [0], [1], [0, 0, 1, 1], [], []>} : vector<8x32xf32>, vector<32x128xf32>, vector<8x128xf32> -> vector<8x128xf32>
    %19 = arith.addf %15, %18 : vector<8x128xf32>
    %c0_11 = arith.constant 0 : index
    %c0_12 = arith.constant 0 : index
    %20 = vector.load %arg6[%c0_11, %c0_12] : memref<128x128xf32, #tpu.memory_space<vmem>>, vector<128x128xf32>
    %cst_13 = arith.constant dense<0.000000e+00> : vector<8x128xf32>
    %21 = tpu.matmul %11, %20, %cst_13 {dimension_numbers = #tpu.dot_dimension_numbers<[1], [0], [0], [1], [0, 0, 1, 1], [], []>} : vector<8x128xf32>, vector<128x128xf32>, vector<8x128xf32> -> vector<8x128xf32>
    %22 = arith.addf %19, %21 : vector<8x128xf32>
    %23 = vector.broadcast %3 : vector<1x128xf32> to vector<8x128xf32>
    %24 = arith.addf %22, %23 : vector<8x128xf32>
    %cst_14 = arith.constant 0.000000e+00 : f32
    %25 = vector.broadcast %cst_14 : f32 to vector<8x128xf32>
    %26 = arith.maximumf %24, %25 : vector<8x128xf32>
    %c0_15 = arith.constant 0 : index
    %c0_16 = arith.constant 0 : index
    %27 = vector.load %arg7[%c0_15, %c0_16] : memref<128x32xf32, #tpu.memory_space<vmem>>, vector<128x32xf32>
    %cst_17 = arith.constant dense<0.000000e+00> : vector<8x32xf32>
    %28 = tpu.matmul %26, %27, %cst_17 {dimension_numbers = #tpu.dot_dimension_numbers<[1], [0], [0], [1], [0, 0, 1, 1], [], []>} : vector<8x128xf32>, vector<128x32xf32>, vector<8x32xf32> -> vector<8x32xf32>
    %c0_18 = arith.constant 0 : index
    %c0_19 = arith.constant 0 : index
    %29 = vector.load %arg8[%c0_18, %c0_19] : memref<1x32xf32, #tpu.memory_space<vmem>>, vector<1x32xf32>
    %30 = vector.broadcast %29 : vector<1x32xf32> to vector<8x32xf32>
    %31 = arith.addf %28, %30 : vector<8x32xf32>
    %c0_20 = arith.constant 0 : index
    %c0_21 = arith.constant 0 : index
    %32 = vector.load %arg9[%c0_20, %c0_21] : memref<8x32xf32, #tpu.memory_space<vmem>>, vector<8x32xf32>
    tpu.vector_store %arg9[%c0_20, %c0_21], %31 {strides = array<i32>} : memref<8x32xf32, #tpu.memory_space<vmem>>, vector<8x32xf32>,
    return
  }
  func.func @transform_0(%arg0: i32) -> (i32, i32) {
    %c0_i32 = arith.constant 0 : i32
    %c0_i32_0 = arith.constant 0 : i32
    return %arg0, %c0_i32 : i32, i32
  }
  func.func @transform_1(%arg0: i32) -> (i32, i32) {
    %c0_i32 = arith.constant 0 : i32
    %c0_i32_0 = arith.constant 0 : i32
    return %arg0, %c0_i32 : i32, i32
  }
  func.func @transform_2(%arg0: i32) -> (i32, i32) {
    %c0_i32 = arith.constant 0 : i32
    %c0_i32_0 = arith.constant 0 : i32
    return %arg0, %c0_i32 : i32, i32
  }
  func.func @transform_3(%arg0: i32) -> (i32, i32) {
    %c0_i32 = arith.constant 0 : i32
    %c0_i32_0 = arith.constant 0 : i32
    %c0_i32_1 = arith.constant 0 : i32
    return %c0_i32, %c0_i32_0 : i32, i32
  }
  func.func @transform_4(%arg0: i32) -> (i32, i32) {
    %c0_i32 = arith.constant 0 : i32
    %c0_i32_0 = arith.constant 0 : i32
    %c0_i32_1 = arith.constant 0 : i32
    return %c0_i32, %c0_i32_0 : i32, i32
  }
  func.func @transform_5(%arg0: i32) -> (i32, i32) {
    %c0_i32 = arith.constant 0 : i32
    %c0_i32_0 = arith.constant 0 : i32
    %c0_i32_1 = arith.constant 0 : i32
    return %c0_i32, %c0_i32_0 : i32, i32
  }
  func.func @transform_6(%arg0: i32) -> (i32, i32) {
    %c0_i32 = arith.constant 0 : i32
    %c0_i32_0 = arith.constant 0 : i32
    %c0_i32_1 = arith.constant 0 : i32
    return %c0_i32, %c0_i32_0 : i32, i32
  }
  func.func @transform_7(%arg0: i32) -> (i32, i32) {
    %c0_i32 = arith.constant 0 : i32
    %c0_i32_0 = arith.constant 0 : i32
    %c0_i32_1 = arith.constant 0 : i32
    return %c0_i32, %c0_i32_0 : i32, i32
  }
  func.func @transform_8(%arg0: i32) -> (i32, i32) {
    %c0_i32 = arith.constant 0 : i32
    %c0_i32_0 = arith.constant 0 : i32
    return %arg0, %c0_i32 : i32, i32
  }
}

</mosaic_0001>

<bundles_post_ra>
// kernel: tpu_custom_call.1
= control target key start
LH: loop header
LB: loop body
LE: loop exit
PB: predicated region body
PF: predicated region fallthrough
CT: control target
= control target key end

     0   :  { %s1777_s0 = inlined_call_operand.hbm [shape: f32[16,32], index: 0, kind: input, shape index: {}]   ;;  %s1778_s1 = inlined_call_operand.hbm [shape: f32[16,32], index: 1, kind: input, shape index: {}]   ;;  %s1779_s2 = inlined_call_operand.vmem [shape: f32[16,1], index: 2, kind: input, shape index: {}]   ;;  %s1780_s3 = inlined_call_operand.hbm [shape: f32[3,128], index: 3, kind: input, shape index: {}]   ;;  %s1781_s4 = inlined_call_operand.vmem [shape: f32[64,128], index: 4, kind: input, shape index: {}]   ;;  %s1782_s5 = inlined_call_operand.vmem [shape: f32[128,128], index: 5, kind: input, shape index: {}]   ;;  %s1783_s6 = inlined_call_operand.vmem [shape: f32[128,32], index: 6, kind: input, shape index: {}]   ;;  %s1784_s7 = inlined_call_operand.vmem [shape: f32[1,32], index: 7, kind: input, shape index: {}]   ;;  %s1785_s8 = inlined_call_operand.hbm [shape: f32[16,32], index: 8, kind: output, shape index: {}]  }
   0x1   :  { %1794 = sst [smem:[#allocation17_spill]] %s1780_s3 }
   0x2   :  { %13 = vsyncpa [#allocation3], 0 }
   0x3   :  { %15 = vsyncpa [#allocation3 + $0x1], 0 }
   0x4   :  { %16 = vsyncpa [#allocation6], 0 }
   0x5   :  { %18 = vsyncpa [#allocation6 + $0x1], 0 }
   0x6   :  { %19 = vsyncpa [#allocation4], 0 }
   0x7   :  { %21 = vsyncpa [#allocation4 + $0x1], 0  ;;  %s1378_s27 = smov 0   ;;  %s1380_s28 = smov 0  }
   0x8   :  { %s1382_s29 = smov 0   ;;  %s1384_s30 = smov 0  }
   0x9 LB: > { %1795 = sst [smem:[#allocation13_spill]] %s1319_s29  ;;  %s1399_s9 = sadd.s32 4294967295, %s1323_s30   ;;  %s1323_s30 = sphi %s1384_s30, %s1819_s30   ;;  %s1319_s29 = sphi %s1382_s29, %s1821_s29   ;;  %s1315_s28 = sphi %s1380_s28, %s1823_s28   ;;  %s1311_s27 = sphi %s1378_s27, %s1822_s27  }
   0xa   : > { %s877_s10 = sadd.s32 4294967294, %s1323_s30   ;;  %p47_p0 = scmp.ne.s32.totalorder %s1315_s28, %s1311_s27 }
   0xb   : > { %p1786_p1 = scmp.eq.s32.totalorder %s1399_s9, 0  ;;  %p234_p3 = scmp.eq.s32.totalorder %s877_s10, 1 }
   0xc   : > { %p878_p5 = scmp.ge.s32.totalorder %s1323_s30, 1  ;;  %p241_p7 = scmp.lt.s32.totalorder %s1323_s30, 3 }
   0xd   : > { %p1408_p4 = por %p1786_p1, %p47_p0  ;;  %p1413_p6 = por %p234_p3, %p47_p0 }
   0xe   : > { %p1418_p8 = pnand %p878_p5, %p241_p7  ;;  %s1325_s14 = smov [#allocation7]  }
   0xf   : > { %s1796_s11 = scalar_select %p1408_p4, 1, 0 }
  0x10   : > { %s1797_s12 = scalar_select %p1413_p6, 1, 0 }
  0x11   : > { %s1799_s13 = scalar_select %p1418_p8, 1, 0 }
  0x12   : > { %1798 = sst [smem:[#allocation14_spill]] %s1797_s12  ;;  %s254_s15 = sshll.u32 %s1325_s14, 4  ;;  %s255_s15 = int_to_ptr.vmem [resolvable:$true] %s254_s15 }
  0x13   : > { %p1104_p10 = pneg %p1418_p8  ;;  %s1426_s16 = sadd.s32 1, %s1323_s30  }
  0x14   : > { %1800 = sst [smem:[#allocation15_spill]] %s1426_s16  ;;  %s31_s18 = ssub.s32 %s1323_s30, %s1426_s16 }
  0x15   : > { %p1430_p11 = pnand %p1104_p10, %p1786_p1  ;;  %p1436_p12 = scmp.eq.s32.totalorder %s31_s18, 0 }
  0x16   : > { %s34_s20 = sadd.s32 1, %s1319_s29  ;;  %s1803_s3 = sld [smem:[#allocation17_spill]] }
  0x17   : > { %s1802_s19 = scalar_select %p1436_p12, 1, 0 }
  0x18   : > { %p1163_p3 = pneg %p1430_p11 }
  0x1c   : > { %s1161_s23 = scalar_lea.hbm %s1803_s3, 64 }
  0x1d   : > { %p1162_p0 = scmp.ne.s32.totalorder %s1803_s3, %s1161_s23  ;;  %p1168_p10 = scmp.lt.u32.totalorder %s1161_s23, %s1803_s3 }
  0x1f   : > { %p1164_p5 = pnand %p1163_p3, %p1162_p0 }
  0x21   : > { %p1165_p7 = pneg %p1164_p5 }
  0x23   : > { %p1170_p9 = pnand %p1168_p10, %p1165_p7 }
  0x25   : > { %1173 = shalt.err (!%p1170_p9)
}
  0x26   : > { %s1174_s14 = scalar_lea.vmem %s255_s15, 64  ;;  %p1182_p6 = scmp.lt.s32.totalorder %s255_s15, %s255_s15 }
  0x27   : > { %p1175_p1 = scmp.ne.s32.totalorder %s255_s15, %s1174_s14  ;;  %p1183_p4 = scmp.lt.s32.totalorder %s1174_s14, %s1174_s14 }
  0x29   : > { %p1177_p2 = pnand %p1175_p1, %p1163_p3  ;;  %p1184_p8 = por %p1183_p4, %p1182_p6 }
  0x2b   : > { %p1178_p13 = pneg %p1177_p2 }
  0x2d   : > { %p1185_p12 = pnand %p1184_p8, %p1178_p13 }
  0x2f   : > { %1188 = shalt.err (!%p1185_p12)
}
  0x30   : > { %1107 = dma.hbm_to_vmem [thread:$0]  (!%p1430_p11), %s1803_s3, 64, %s255_s15, [#allocation6]  }
  0x31   : > { %p1804_p1 = scmp.ne.s32.totalorder %s1802_s19, 0  ;;  %p42_p2 = scmp.eq.s32.totalorder %s1323_s30, 0 }
  0x32   : > { %p1806_p4 = scmp.ne.s32.totalorder %s1319_s29, %s1315_s28  ;;  %p1807_p6 = scmp.eq.s32.totalorder %s1399_s9, 1 }
  0x33   : > { %s1462_s22 = scalar_select %p1804_p1, %s1319_s29, %s34_s20  }
  0x34   : > { %p1470_p8 = por %p1807_p6, %p1806_p4  ;;  %p1120_p9 = scmp.lt.s32.totalorder %s1323_s30, 2 }
  0x35   : > { %1805 = sst [smem:[#allocation16_spill]] %s1462_s22  ;;  %s277_s23 = sand.u32 1, %s1319_s29  }
  0x36   : > { %s1808_s17 = scalar_select %p1470_p8, 1, 0 }
  0x37   : > { %p1809_p12 = pmov %p1806_p4  ;;  %s1479_s24 = sshll.u32 %s277_s23, 3 }
  0x38   : > { %s882_s25 = sshll.u32 %s1323_s30, 7  ;;  %s281_s20 = scalar_lea.vmem [#allocation2], %s1479_s24 }
  0x39   : > { %p43_p13 = por %p42_p2, %p1809_p12  ;;  %s1485_s19 = scalar_lea.hbm %s1777_s0, %s882_s25 }
  0x3a   : > { %s288_s10 = sshll.u32 %s281_s20, 4  ;;  %s1497_s26 = scalar_lea.hbm %s1778_s1, %s882_s25  ;;  %s1492_s10 = int_to_ptr.vmem [resolvable:$true] %s288_s10 }
  0x3b   : > { %p1488_p11 = pnand %p1120_p9, %p43_p13  ;;  %s278_s15 = scalar_lea.sflag [#allocation3], %s277_s23 }
  0x3c   : > { %s1189_s3 = scalar_lea.hbm %s1485_s19, 128  ;;  %s1194_s29 = scalar_lea.hbm %s1777_s0, 256 }
  0x3d   : > { %p1190_p0 = scmp.ne.s32.totalorder %s1485_s19, %s1189_s3  ;;  %p1191_p3 = pneg %p1488_p11 }
  0x3e   : > { %p1195_p10 = scmp.lt.u32.totalorder %s1485_s19, %s1777_s0  ;;  %p1196_p1 = scmp.lt.u32.totalorder %s1194_s29, %s1189_s3 }
  0x3f   : > { %p1192_p5 = pnand %p1191_p3, %p1190_p0  ;;  %p1198_p4 = scmp.lt.u32.totalorder %s1189_s3, %s1485_s19 }
  0x40   : > { %p1197_p2 = por %p1196_p1, %p1195_p10 }
  0x41   : > { %p1193_p7 = pneg %p1192_p5 }
  0x42   : > { %p1199_p6 = por %p1198_p4, %p1197_p2 }
  0x44   : > { %p1200_p9 = pnand %p1199_p6, %p1193_p7 }
  0x46   : > { %1203 = shalt.err (!%p1200_p9)
}
  0x47   : > { %s1204_s23 = scalar_lea.vmem %s1492_s10, 128  ;;  %s1326_s22 = smov [#allocation2]  }
  0x48   : > { %p1205_p12 = scmp.ne.s32.totalorder %s1492_s10, %s1204_s23  ;;  %s1209_s25 = sshll.u32 %s1326_s22, 4  ;;  %s1210_s25 = int_to_ptr.vmem [resolvable:$false] %s1209_s25 }
  0x49   : > { %s1211_s12 = scalar_lea.vmem %s1210_s25, 256  ;;  %p1212_p5 = scmp.lt.s32.totalorder %s1492_s10, %s1210_s25 }
  0x4a   : > { %p1207_p13 = pnand %p1205_p12, %p1191_p3  ;;  %p1213_p10 = scmp.lt.s32.totalorder %s1211_s12, %s1204_s23 }
  0x4c   : > { %p1208_p0 = pneg %p1207_p13  ;;  %p1214_p1 = por %p1213_p10, %p1212_p5 }
  0x4e   : > { %p1215_p2 = pnand %p1214_p1, %p1208_p0 }
  0x50   : > { %1218 = shalt.err (!%p1215_p2)
}
  0x51   : > { %1111 = dma.hbm_to_vmem [thread:$0]  (!%p1488_p11), %s1485_s19, 128, %s1492_s10, %s278_s15  }
  0x52   : > { %s295_s3 = sand.u32 1, %s1323_s30   ;;  %s299_s29 = scalar_lea.vmem [#allocation5], %s1479_s24 }
  0x53   : > { %s306_s16 = sshll.u32 %s299_s29, 4  ;;  %s296_s18 = scalar_lea.sflag [#allocation6], %s295_s3  ;;  %s307_s16 = int_to_ptr.vmem [resolvable:$true] %s306_s16 }
  0x54   : > { %s1219_s21 = scalar_lea.hbm %s1497_s26, 128  ;;  %s1224_s22 = scalar_lea.hbm %s1778_s1, 256 }
  0x55   : > { %p1220_p7 = scmp.ne.s32.totalorder %s1497_s26, %s1219_s21  ;;  %p1225_p9 = scmp.lt.u32.totalorder %s1497_s26, %s1778_s1 }
  0x56   : > { %p1226_p12 = scmp.lt.u32.totalorder %s1224_s22, %s1219_s21  ;;  %p1228_p0 = scmp.lt.u32.totalorder %s1219_s21, %s1497_s26 }
  0x57   : > { %p1222_p4 = pnand %p1220_p7, %p1191_p3 }
  0x58   : > { %p1227_p13 = por %p1226_p12, %p1225_p9 }
  0x59   : > { %p1223_p6 = pneg %p1222_p4 }
  0x5a   : > { %p1229_p5 = por %p1228_p0, %p1227_p13 }
  0x5c   : > { %p1230_p10 = pnand %p1229_p5, %p1223_p6 }
  0x5e   : > { %1233 = shalt.err (!%p1230_p10)
}
  0x5f   : > { %s1234_s24 = scalar_lea.vmem %s307_s16, 128  ;;  %s1327_s19 = smov [#allocation5]  }
  0x60   : > { %p1235_p1 = scmp.ne.s32.totalorder %s307_s16, %s1234_s24  ;;  %s1239_s10 = sshll.u32 %s1327_s19, 4  ;;  %s1240_s10 = int_to_ptr.vmem [resolvable:$false] %s1239_s10 }
  0x61   : > { %s1241_s15 = scalar_lea.vmem %s1240_s10, 256  ;;  %p1242_p4 = scmp.lt.s32.totalorder %s307_s16, %s1240_s10 }
  0x62   : > { %p1237_p2 = pnand %p1235_p1, %p1191_p3  ;;  %p1243_p8 = scmp.lt.s32.totalorder %s1241_s15, %s1234_s24 }
  0x64   : > { %p1238_p7 = pneg %p1237_p2  ;;  %p1244_p9 = por %p1243_p8, %p1242_p4 }
  0x66   : > { %p1245_p12 = pnand %p1244_p9, %p1238_p7 }
  0x68   : > { %1248 = shalt.err (!%p1245_p12)
}
  0x69   : > { %1114 = dma.hbm_to_vmem [thread:$0]  (!%p1488_p11), %s1497_s26, 128, %s307_s16, %s296_s18  }
  0x6a   : > { %p1811_p6 = scmp.ne.s32.totalorder %s1799_s13, 0 }
  0x6b   : > { %s1548_s3 = sand.u32 (!%p1811_p6), 1, %s1315_s28   ;;  %p1812_p8 = scmp.ne.s32.totalorder (!%p1811_p6), %s1796_s11, 0 }
  0x6c   : > { %322 = sbr.rel (%p1811_p6) target bundleno = 709 (0x2c5), region = 52  ;;  %s1551_s29 = sshll.u32 (!%p1811_p6), %s1548_s3, 3 }
  0x6d   : > { %s325_s21 = scalar_lea.sflag (!%p1811_p6), [#allocation3], %s1548_s3  ;;  %s328_s20 = scalar_lea.vmem (!%p1811_p6), [#allocation2], %s1551_s29 }
  0x73   : > { %1294 = dma.done.wait (%p1812_p8), %s325_s21, 128  }
  0x74   : > { %1296 = vsyncadd (%p1812_p8), %s325_s21, 4294967168  ;;  %s333_s13 = sand.u32 1, %s1399_s9   ;;  %s337_s26 = scalar_lea.vmem [#allocation5], %s1551_s29 }
  0x75   : > { %s334_s14 = scalar_lea.sflag [#allocation6], %s333_s13 }
  0x76   : > { %1298 = dma.done.wait (%p1812_p8), %s334_s14, 128  }
  0x77   : > { %1300 = vsyncadd (%p1812_p8), %s334_s14, 4294967168  ;;  %p1813_p11 = scmp.eq.s32.totalorder %s1399_s9, 0 }
  0x79   : > { %1302 = dma.done.wait (%p1813_p11), [#allocation6], 64   ;;  %p1814_p3 = pmov %p1813_p11 }
  0x7a   : > { %p383_p13 = scmp.lt.s32.totalorder %s1399_s9, 1  ;;  %v1328_v0 = vmov 0   ;;  %v1329_v1 = vmov 0.0|0.0   ;;  %vm1330_vm0 = vmmov 0   ;;  %v1331_v2 = vmov 0.0   ;;  %v409_v4 = vld [vmem:[%s1781_s4 + $0x20] sm:$0xff] }
  0x7b   : > { %1304 = vsyncadd (%p1814_p3), [#allocation6], 4294967232  ;;  %1160 = vset.pattern.permute.xlu0 %v1328_v0  ;;  %1034 = vmatprep.subr.bf16.mxu0 %v1329_v1  ;;  %v410_v5 = vld [vmem:[%s1781_s4 + $0x28] sm:$0xff]  ;;  %v405_v7 = vld [vmem:[%s1781_s4] sm:$0xff]  ;;  %vm415_vm1 = vcmask 261120   ;;  %v394_v59 = vlaneseq  ;;  %s895_s10 = sshll.u32 %s1399_s9, 7 }
  0x7c   : > { %s384_s16 = scalar_select %p383_p13, %s1399_s9, 1  ;;  %1040 = vmatprep.subr.bf16.mxu1 %v1329_v1  ;;  %950 = vmatprep.mubr.msk.f32.mxu0 %vm1330_vm0, %v1331_v2  ;;  %v1035_v6 = vpack.c.bf16 %v410_v5, %v409_v4  ;;  %v406_v8 = vld [vmem:[%s1781_s4 + $0x8] sm:$0xff]  ;;  %v411_v9 = vld [vmem:[%s1781_s4 + $0x30] sm:$0xff]  ;;  %v412_v11 = vld [vmem:[%s1781_s4 + $0x38] sm:$0xff] }
  0x7d   : > { %961 = vmatprep.mubr.msk.f32.mxu1 %vm1330_vm0, %v1331_v2  ;;  %v1041_v10 = vpack.c.bf16 %v406_v8, %v405_v7  ;;  %v407_v12 = vld [vmem:[%s1781_s4 + $0x10] sm:$0xff]  ;;  %v408_v13 = vld [vmem:[%s1781_s4 + $0x18] sm:$0xff]  ;;  %v1038_v14 = vpack.c.bf16 %v412_v11, %v411_v9  ;;  %v562_v16 = vld [vmem:[%s1782_s5] sm:$0xff]  ;;  %v395_v61 = vshrl.u32 %v394_v59, 7  ;;  %s382_s15 = scalar_lea.vmem [#allocation8], %s1551_s29  ;;  %p1815_p5 = scmp.ne.s32.totalorder %s1808_s17, 0 }
  0x7e   : > { %s890_s11 = sshll.u32 %s384_s16, 3  ;;  %1036 = vmatpush3.bf16.msra.mxu0 %v1035_v6  ;;  %v1044_v15 = vpack.c.bf16 %v408_v13, %v407_v12  ;;  %v563_v17 = vld [vmem:[%s1782_s5 + $0x8] sm:$0xff]  ;;  %v414_v18 = vld [vmem:[%s337_s26] sm:$0xff]  ;;  %v566_v24 = vld [vmem:[%s1782_s5 + $0x20] sm:$0xff]  ;;  %s763_s21 = sshll.u32 %s382_s15, 4  ;;  %s1734_s21 = int_to_ptr.vmem [resolvable:$true] %s763_s21 }
  0x7f   : > { %s386_s22 = scalar_lea.vmem %s1779_s2, %s890_s11  ;;  %1042 = vmatpush3.bf16.msra.mxu1 %v1041_v10  ;;  %1037 = vmatprep.subr.bf16.mxu0 %v1329_v1  ;;  %v1047_v19 = vpack.c.bf16 %v563_v17, %v562_v16  ;;  %v413_v20 = vld [vmem:[%s328_s20] sm:$0xff]  ;;  %v564_v21 = vld [vmem:[%s1782_s5 + $0x10] sm:$0xff]  ;;  %v565_v22 = vld [vmem:[%s1782_s5 + $0x18] sm:$0xff]  ;;  %v396_v62 = vsub.s32 0, %v395_v61  ;;  %v401_v0 = vsub.s32 1, %v395_v61  ;;  %s1732_s16 = scalar_lea.hbm %s1785_s8, %s895_s10 }
  0x80   : > { %v388_v3 = vld [vmem:[%s386_s22] sm:$0xff]  ;;  %1043 = vmatprep.subr.bf16.mxu1 %v1329_v1  ;;  %v1050_v23 = vpack.c.bf16 %v565_v22, %v564_v21  ;;  %v567_v25 = vld [vmem:[%s1782_s5 + $0x28] sm:$0xff]  ;;  %v568_v27 = vld [vmem:[%s1782_s5 + $0x30] sm:$0xff]  ;;  %s750_s26 = scalar_lea.sflag [#allocation4], %s1548_s3  ;;  %s1249_s20 = scalar_lea.vmem %s1734_s21, 128 }
  0x81   : > { %391 = vperm.xlu0 %1160, %v388_v3   ;;  %v1053_v26 = vpack.c.bf16 %v567_v25, %v566_v24  ;;  %v569_v28 = vld [vmem:[%s1782_s5 + $0x38] sm:$0xff]  ;;  %v570_v30 = vld [vmem:[%s1782_s5 + $0x40] sm:$0xff]  ;;  %v571_v31 = vld [vmem:[%s1782_s5 + $0x48] sm:$0xff]  ;;  %p1250_p0 = scmp.ne.s32.totalorder %s1734_s21, %s1249_s20  ;;  %s1332_s9 = smov [#allocation8]  }
  0x82   : > { %1039 = vmatpush3.bf16.msra.mxu0 %v1038_v14  ;;  %v1056_v29 = vpack.c.bf16 %v569_v28, %v568_v27  ;;  %v1059_v32 = vpack.c.bf16 %v571_v31, %v570_v30  ;;  %v572_v33 = vld [vmem:[%s1782_s5 + $0x50] sm:$0xff]  ;;  %v573_v34 = vld [vmem:[%s1782_s5 + $0x58] sm:$0xff]  ;;  %v574_v36 = vld [vmem:[%s1782_s5 + $0x60] sm:$0xff]  ;;  %s1253_s29 = sshll.u32 %s1332_s9, 4  ;;  %s1254_s29 = int_to_ptr.vmem [resolvable:$false] %s1253_s29 }
  0x83   : > { %1045 = vmatpush3.bf16.msra.mxu1 %v1044_v15  ;;  %1046 = vmatprep.subr.bf16.mxu0 %v1329_v1  ;;  %v1062_v35 = vpack.c.bf16 %v573_v34, %v572_v33  ;;  %v575_v37 = vld [vmem:[%s1782_s5 + $0x68] sm:$0xff]  ;;  %v576_v39 = vld [vmem:[%s1782_s5 + $0x70] sm:$0xff]  ;;  %v577_v40 = vld [vmem:[%s1782_s5 + $0x78] sm:$0xff]  ;;  %p1251_p10 = pnand %p1250_p0, %p1815_p5  ;;  %s1255_s11 = scalar_lea.vmem %s1254_s29, 256 }
  0x84   : > { %1070 = vmatprep.subr.bf16.mxu1 %v1329_v1  ;;  %v1065_v38 = vpack.c.bf16 %v575_v37, %v574_v36  ;;  %v1068_v41 = vpack.c.bf16 %v577_v40, %v576_v39  ;;  %v655_v42 = vld [vmem:[%s1783_s6] sm:$0xff]  ;;  %v656_v43 = vld [vmem:[%s1783_s6 + $0x8] sm:$0xff]  ;;  %v657_v44 = vld [vmem:[%s1783_s6 + $0x10] sm:$0xff]  ;;  %p1256_p2 = scmp.lt.s32.totalorder %s1734_s21, %s1254_s29  ;;  %p1257_p7 = scmp.lt.s32.totalorder %s1255_s11, %s1249_s20 }
  0x85   : > { %951 = vmatmul.mubr.msk.f32.vlgmr.msra.gmra.mrb[0].mxu0 %vm415_vm1, %v414_v18  ;;  %v1071_v45 = vpack.c.bf16 %v656_v43, %v655_v42  ;;  %v658_v46 = vld [vmem:[%s1783_s6 + $0x18] sm:$0xff]  ;;  %v659_v48 = vld [vmem:[%s1783_s6 + $0x20] sm:$0xff]  ;;  %v660_v49 = vld [vmem:[%s1783_s6 + $0x28] sm:$0xff]  ;;  %p1252_p1 = pneg %p1251_p10 }
  0x86   : > { %962 = vmatmul.mubr.msk.f32.vlgmr.msra.gmra.mrb[0].mxu1 %vm415_vm1, %v413_v20  ;;  %1048 = vmatpush3.bf16.msra.mxu0 %v1047_v19  ;;  %v1074_v47 = vpack.c.bf16 %v658_v46, %v657_v44  ;;  %v1077_v50 = vpack.c.bf16 %v660_v49, %v659_v48  ;;  %v661_v51 = vld [vmem:[%s1783_s6 + $0x30] sm:$0xff]  ;;  %v662_v52 = vld [vmem:[%s1783_s6 + $0x38] sm:$0xff]  ;;  %v663_v54 = vld [vmem:[%s1783_s6 + $0x40] sm:$0xff]  ;;  %v651_v19 = vsub.s32 2, %v395_v61  ;;  %p1258_p4 = por %p1257_p7, %p1256_p2 }
  0x87   : > { %1049 = vmatprep.subr.bf16.mxu0 %v1329_v1  ;;  %996 = vmatprep.mubr.msk.f32.mxu0 %vm1330_vm0, %v1331_v2  ;;  %v1080_v53 = vpack.c.bf16 %v662_v52, %v661_v51  ;;  %v664_v55 = vld [vmem:[%s1783_s6 + $0x48] sm:$0xff]  ;;  %v665_v57 = vld [vmem:[%s1783_s6 + $0x50] sm:$0xff]  ;;  %v666_v58 = vld [vmem:[%s1783_s6 + $0x58] sm:$0xff] }
  0x88   : > { %1031 = vmatprep.mubr.msk.f32.mxu1 %vm1330_vm0, %v1331_v2  ;;  %1072 = vmatpush3.bf16.msra.mxu1 %v1071_v45  ;;  %v1083_v56 = vpack.c.bf16 %v664_v55, %v663_v54  ;;  %v1086_v60 = vpack.c.bf16 %v666_v58, %v665_v57  ;;  %v387_v63 = vld [vmem:[#allocation7] sm:$0x7]  ;;  %v668_v9 = vld [vmem:[%s1783_s6 + $0x68] sm:$0xff]  ;;  %v669_v11 = vld [vmem:[%s1783_s6 + $0x70] sm:$0xff]  ;;  %p1259_p9 = pnand %p1258_p4, %p1252_p1 }
  0x89   : > { %1073 = vmatprep.subr.bf16.mxu1 %v1329_v1  ;;  %v397_v2 = vrot.slane %v387_v63, %v396_v62  ;;  %v402_v3 = vrot.slane %v387_v63, %v401_v0  ;;  %v667_v8 = vld [vmem:[%s1783_s6 + $0x60] sm:$0xff]  ;;  %v670_v12 = vld [vmem:[%s1783_s6 + $0x78] sm:$0xff]  ;;  %v652_v20 = vrot.slane %v387_v63, %v651_v19 }
  0x8a   : > { %1051 = vmatpush3.bf16.msra.mxu0 %v1050_v23  ;;  %v1089_v10 = vpack.c.bf16 %v668_v9, %v667_v8  ;;  %v1092_v13 = vpack.c.bf16 %v670_v12, %v669_v11  ;;  %v893_v25 = vld [vmem:[%s1784_s7] ss:$0 sm:$0xff] }
  0x8b   : > { %1052 = vmatprep.subr.bf16.mxu0 %v1329_v1 }
  0x8c   : > { %1075 = vmatpush3.bf16.msra.mxu1 %v1074_v47 }
  0x8d   : > { %1076 = vmatprep.subr.bf16.mxu1 %v1329_v1 }
  0x8e   : > { %1054 = vmatpush3.bf16.msra.mxu0 %v1053_v26 }
  0x8f   : > { %1055 = vmatprep.subr.bf16.mxu0 %v1329_v1 }
  0x90   : > { %1078 = vmatpush3.bf16.msra.mxu1 %v1077_v50 }
  0x91   : > { %1079 = vmatprep.subr.bf16.mxu1 %v1329_v1 }
  0x92   : > { %1057 = vmatpush3.bf16.msra.mxu0 %v1056_v29 }
  0x93   : > { %1058 = vmatprep.subr.bf16.mxu0 %v1329_v1 }
  0x94   : > { %1081 = vmatpush3.bf16.msra.mxu1 %v1080_v53 }
  0x95   : > { %1082 = vmatprep.subr.bf16.mxu1 %v1329_v1 }
  0x96   : > { %1060 = vmatpush3.bf16.msra.mxu0 %v1059_v32 }
  0x97   : > { %1061 = vmatprep.subr.bf16.mxu0 %v1329_v1 }
  0x98   : > { %1084 = vmatpush3.bf16.msra.mxu1 %v1083_v56 }
  0x99   : > { %1085 = vmatprep.subr.bf16.mxu1 %v1329_v1 }
  0x9a   : > { %1063 = vmatpush3.bf16.msra.mxu0 %v1062_v35 }
  0x9b   : > { %1064 = vmatprep.subr.bf16.mxu0 %v1329_v1 }
  0x9c   : > { %1087 = vmatpush3.bf16.msra.mxu1 %v1086_v60 }
  0x9d   : > { %1088 = vmatprep.subr.bf16.mxu1 %v1329_v1 }
  0x9e   : > { %1066 = vmatpush3.bf16.msra.mxu0 %v1065_v38 }
  0x9f   : > { %1067 = vmatprep.subr.bf16.mxu0 %v1329_v1 }
  0xa0   : > { %1090 = vmatpush3.bf16.msra.mxu1 %v1089_v10 }
  0xa1   : > { %1091 = vmatprep.subr.bf16.mxu1 %v1329_v1 }
  0xa2   : > { %1069 = vmatpush3.bf16.msra.mxu0 %v1068_v41 }
  0xa4   : > { %1093 = vmatpush3.bf16.msra.mxu1 %v1092_v13 }
 0x100   : > { %v392_v4 = vpop.permute.xlu0 %391 }
 0x101   : > { %v398_v5 = vmul.f32 %v397_v2, %v392_v4 }
 0x103   : > { %v403_v6 = vadd.f32 %v402_v3, %v398_v5 }
 0x105   : > { %v404_v7 = vmax.f32 %v403_v6, 0.0 }
 0x107   : > { %997 = vmatmul.mubr.f32.vlgmr.msra.gmra.mrb[2].mxu0 %v404_v7 }
 0x158   : > { %v485_v14 = vpop.f32.mrb[0].mxu0 }
 0x159   : > { %v952_v15 = vpop.f32.mrb[1].mxu0  ;;  %v558_v16 = vpop.f32.mrb[0].mxu1 }
 0x15a   : > { %v559_v17 = vadd.f32 %v558_v16, %v485_v14  ;;  %v963_v18 = vpop.f32.mrb[1].mxu1 }
 0x1da   : > { %v644_v1 = vpop.f32.mrb[2].mxu0 }
 0x1db   : > { %v648_v21 = vadd.f32 %v644_v1, %v559_v17  ;;  %v998_v22 = vpop.f32.mrb[3].mxu0 }
 0x1dd   : > { %v653_v23 = vadd.f32 %v652_v20, %v648_v21 }
 0x1df   : > { %v654_v24 = vmax.f32 %v653_v23, 0.0 }
 0x1e1   : > { %1032 = vmatmul.mubr.f32.vlgmr.msra.gmra.mrb[2].mxu1 %v654_v24 }
 0x2b4   : > { %v744_v26 = vpop.f32.mrb[2].mxu1 }
 0x2b5   : > { %v745_v27 = vadd.f32 %v893_v25, %v744_v26  ;;  %v1033_v28 = vpop.f32.mrb[3].mxu1 }
 0x2b7   : > { %748 = vst.msk [vmem:[%s382_s15] sm:$0xff] %vm415_vm1, %v745_v27 }
 0x2b8   : > { %1262 = shalt.err (!%p1259_p9)
}
 0x2b9   : > { %s1263_s3 = scalar_lea.hbm %s1732_s16, 128  ;;  %s1267_s22 = scalar_lea.hbm %s1785_s8, 256 }
 0x2ba   : > { %p1264_p12 = scmp.ne.s32.totalorder %s1732_s16, %s1263_s3  ;;  %p1268_p11 = scmp.lt.u32.totalorder %s1732_s16, %s1785_s8 }
 0x2bb   : > { %p1269_p3 = scmp.lt.u32.totalorder %s1267_s22, %s1263_s3  ;;  %p1271_p0 = scmp.lt.u32.totalorder %s1263_s3, %s1732_s16 }
 0x2bc   : > { %p1265_p6 = pnand %p1264_p12, %p1815_p5 }
 0x2bd   : > { %p1270_p13 = por %p1269_p3, %p1268_p11 }
 0x2be   : > { %p1266_p8 = pneg %p1265_p6 }
 0x2bf   : > { %p1272_p10 = por %p1271_p0, %p1270_p13 }
 0x2c1   : > { %p1273_p1 = pnand %p1272_p10, %p1266_p8 }
 0x2c3   : > { %1276 = shalt.err (!%p1273_p1)
}
 0x2c4   : > { %1102 = dma.vmem_to_hbm [thread:$0]  (%p1815_p5), %s1734_s21, 128, %s1732_s16, %s750_s26  }
 0x2c5 PF: > { %s1816_s24 = sld [smem:[#allocation14_spill]]  ;;  %s775_s19 = sand.u32 1, %s1311_s27  }
 0x2c6   : > { %p1818_p7 = scmp.ge.s32.totalorder %s1323_s30, 2  ;;  %s776_s10 = scalar_lea.sflag [#allocation4], %s775_s19 }
 0x2cb   : > { %p1817_p2 = scmp.ne.s32.totalorder %s1816_s24, 0 }
 0x2cd   : > { %p1116_p4 = pnand %p1818_p7, %p1817_p2 }
 0x2cf   : > { %1306 = dma.done.wait (!%p1116_p4), %s776_s10, 128  }
 0x2d0   : > { %1308 = vsyncadd (!%p1116_p4), %s776_s10, 4294967168  ;;  %s1819_s30 = sld [smem:[#allocation15_spill]]  ;;  %s1820_s15 = sld [smem:[#allocation13_spill]] }
 0x2d1   : > { %s1821_s29 = sld [smem:[#allocation16_spill]]  ;;  %s1822_s27 = smov %s1315_s28 }
 0x2d6   : > { %p24_p9 = scmp.ge.s32.totalorder %s1819_s30, 4   ;;  %s1823_s28 = smov %s1820_s15 }
 0x2d8   :  { %26 = sbr.rel (!%p24_p9) target bundleno = 9 (0x9), region = 117 }
 0x2df   :  { %781 = vsyncpa [#allocation3], 1 }
 0x2e0   :  { %783 = vsyncpa [#allocation3 + $0x1], 1 }
 0x2e1   :  { %784 = vsyncpa [#allocation6], 1 }
 0x2e2   :  { %786 = vsyncpa [#allocation6 + $0x1], 1 }
 0x2e3   :  { %787 = vsyncpa [#allocation4], 1 }
 0x2e4   :  { %789 = vsyncpa [#allocation4 + $0x1], 1 }

</bundles_post_ra>
